<compile_context>
chip_gen: v7x
topology: tpu7x:2x2x1
jax: 0.10.0
libtpu: 0.0.40
codegen_flags: <defaults>
</compile_context>

<pallas_src>
import functools

import jax
import jax.numpy as jnp
from jax.experimental import pallas as pl
from jax.experimental.pallas import tpu as pltpu


def _round_up(a, m):
    return (a + m - 1) // m * m


def _sublane(dtype):
    # Packed sublane tile: 8 rows for 32-bit, 16 for bf16, 32 for int8/fp8 dtypes.
    return max(8, 32 // jnp.dtype(dtype).itemsize)


def _vmem_limits():
    try:
        info = pltpu.get_tpu_info()
        cap = int(getattr(info, "vmem_capacity_bytes", 64 * 1024 * 1024))
    except Exception:  # query unavailable -> conservative (fits every generation)
        cap = 64 * 1024 * 1024
    # Leave headroom for compiler scratch: scoped limit ~75% of physical (capped at
    # 100 MiB), and size our block footprints against ~80% of that limit.
    limit = min(int(cap * 0.75), 100 * 1024 * 1024)
    budget = int(limit * 0.8)
    return limit, budget


# ----------------------------- fused single-pass kernel -----------------------------

def _ln_fused_kernel(x_ref, w_ref, b_ref, o_ref, *, eps, d_true):
    # x_ref: (TN, Dp) lane-dense block of flattened samples; per-row statistics.
    x = x_ref[...].astype(jnp.float32)
    s = jnp.sum(x, axis=-1, keepdims=True)
    sq = jnp.sum(x * x, axis=-1, keepdims=True)
    mean = s * (1.0 / d_true)
    # torch.std default: unbiased variance (Bessel); eps is added to the std.
    var = (sq - d_true * mean * mean) / (d_true - 1.0)
    var = jnp.maximum(var, 0.0)
    inv = 1.0 / (jnp.sqrt(var) + eps)

    w = w_ref[...].astype(jnp.float32)
    b = b_ref[...].astype(jnp.float32)
    o_ref[...] = ((x - mean) * inv * w + b).astype(o_ref.dtype)


# ------------------------- two-pass D-tiled kernels (large D) ------------------------

def _ln_stats_kernel(x_ref, mean_ref, inv_ref, sum_sc, sq_sc, *, eps, d_true):
    di = pl.program_id(1)

    @pl.when(di == 0)
    def _():
        sum_sc[...] = jnp.zeros_like(sum_sc)
        sq_sc[...] = jnp.zeros_like(sq_sc)

    x = x_ref[...].astype(jnp.float32)
    sum_sc[...] += jnp.sum(x, axis=-1, keepdims=True)
    sq_sc[...] += jnp.sum(x * x, axis=-1, keepdims=True)

    @pl.when(di == pl.num_programs(1) - 1)
    def _():
        mean = sum_sc[...] * (1.0 / d_true)
        var = (sq_sc[...] - d_true * mean * mean) / (d_true - 1.0)
        var = jnp.maximum(var, 0.0)
        mean_ref[...] = mean
        inv_ref[...] = 1.0 / (jnp.sqrt(var) + eps)


def _ln_apply_kernel(x_ref, mean_ref, inv_ref, w_ref, b_ref, o_ref):
    x = x_ref[...].astype(jnp.float32)
    w = w_ref[...].astype(jnp.float32)
    b = b_ref[...].astype(jnp.float32)
    o_ref[...] = ((x - mean_ref[...]) * inv_ref[...] * w + b).astype(o_ref.dtype)


# ------------------------------------- wrapper --------------------------------------

def layer_norm_channels_first(x, weight, bias, eps=1e-6, *,
                              force_two_pass=False, _max_td=None):
    """x: (N, C, H, W); weight, bias: (C, H, W). Stats over dims (1, 2, 3)."""
    N, C, H, W = x.shape
    D = C * H * W
    assert weight.shape == (C, H, W) and bias.shape == (C, H, W)

    out_dtype = x.dtype
    itemsize = jnp.dtype(x.dtype).itemsize
    w_item = jnp.dtype(weight.dtype).itemsize

    # Layout plumbing (outside the kernel): lane-dense last dim, padded to x128 so all
    # vector stores are unmasked. Zero padding is exact because stats use sum / sumsq
    # divided by the true D, and padded weight/bias are zero (sliced off afterwards).
    Dp = _round_up(D, 128)
    x2 = x.reshape(N, D)
    w2 = weight.reshape(1, D)
    b2 = bias.reshape(1, D)
    if Dp != D:
        pad = ((0, 0), (0, Dp - D))
        x2 = jnp.pad(x2, pad)
        w2 = jnp.pad(w2, pad)
        b2 = jnp.pad(b2, pad)

    sub = _sublane(x.dtype)
    vmem_limit, budget = _vmem_limits()

    # Fused-path footprint: double-buffered x block + double-buffered out block +
    # ~8 B/elem of f32 temps, plus resident weight/bias (+ their f32 upcasts).
    per_row = Dp * (2 * itemsize + 2 * itemsize + 8)
    fixed = 4 * Dp * w_item + 8 * Dp
    min_rows = N if N < sub else sub
    rows_fit = (budget - fixed) // per_row if budget > fixed else 0
    use_fused = (not force_two_pass) and rows_fit >= min_rows

    if use_fused:
        if N <= sub:
            tn = N  # block dim == full array dim (allowed); tiny batch, one step
        else:
            # Keep >= 4 grid steps so DMA/compute overlap and the batch axis can
            # shard across both v7x TensorCores; never exceed the VMEM budget.
            cap = _round_up(max(1, -(-N // 4)), sub)
            tn = min((rows_fit // sub) * sub, cap)
            tn = max(tn, sub)
        grid = (-(-N // tn),)

        kernel = functools.partial(_ln_fused_kernel, eps=float(eps), d_true=float(D))
        out2 = pl.pallas_call(
            kernel,
            out_shape=jax.ShapeDtypeStruct((N, Dp), out_dtype),
            grid_spec=pltpu.PrefetchScalarGridSpec(
                num_scalar_prefetch=0,
                grid=grid,
                in_specs=[
                    pl.BlockSpec((tn, Dp), lambda n: (n, 0)),
                    pl.BlockSpec((1, Dp), lambda n: (0, 0)),
                    pl.BlockSpec((1, Dp), lambda n: (0, 0)),
                ],
                out_specs=pl.BlockSpec((tn, Dp), lambda n: (n, 0)),
            ),
            compiler_params=pltpu.CompilerParams(
                dimension_semantics=("parallel",),
                vmem_limit_bytes=vmem_limit,
            ),
            cost_estimate=pl.CostEstimate(
                flops=8 * N * Dp,
                transcendentals=N,
                bytes_accessed=2 * N * Dp * itemsize + 2 * Dp * w_item,
            ),
        )(x2, w2, b2)
    else:
        # -------- two-pass D-tiled path: per-row footprint too big for VMEM --------
        tn1 = N if N < sub else sub
        # Column tile from the (larger) apply-pass footprint.
        per_col = tn1 * (2 * itemsize + 2 * itemsize + 8) + 4 * w_item + 8
        td_max = max(128, budget // per_col)
        if _max_td is not None:
            td_max = max(128, min(td_max, _max_td))
        # Largest multiple of 128 that divides Dp and is <= td_max (no ragged tail).
        m = Dp // 128
        g = 1
        for cand in range(min(m, td_max // 128), 0, -1):
            if m % cand == 0:
                g = cand
                break
        td = 128 * g
        n_blocks = -(-N // tn1)
        d_blocks = Dp // td

        stats_kernel = functools.partial(_ln_stats_kernel, eps=float(eps),
                                         d_true=float(D))
        mean, inv = pl.pallas_call(
            stats_kernel,
            out_shape=(jax.ShapeDtypeStruct((N, 1), jnp.float32),
                       jax.ShapeDtypeStruct((N, 1), jnp.float32)),
            grid_spec=pltpu.PrefetchScalarGridSpec(
                num_scalar_prefetch=0,
                grid=(n_blocks, d_blocks),
                in_specs=[pl.BlockSpec((tn1, td), lambda n, d: (n, d))],
                out_specs=(pl.BlockSpec((tn1, 1), lambda n, d: (n, 0)),
                           pl.BlockSpec((tn1, 1), lambda n, d: (n, 0))),
                scratch_shapes=[pltpu.VMEM((tn1, 1), jnp.float32),
                                pltpu.VMEM((tn1, 1), jnp.float32)],
            ),
            compiler_params=pltpu.CompilerParams(
                dimension_semantics=("parallel", "arbitrary"),
                vmem_limit_bytes=vmem_limit,
            ),
            cost_estimate=pl.CostEstimate(
                flops=3 * N * Dp,
                transcendentals=N,
                bytes_accessed=N * Dp * itemsize + 8 * N,
            ),
        )(x2)

        out2 = pl.pallas_call(
            _ln_apply_kernel,
            out_shape=jax.ShapeDtypeStruct((N, Dp), out_dtype),
            grid_spec=pltpu.PrefetchScalarGridSpec(
                num_scalar_prefetch=0,
                grid=(n_blocks, d_blocks),
                in_specs=[
                    pl.BlockSpec((tn1, td), lambda n, d: (n, d)),
                    pl.BlockSpec((tn1, 1), lambda n, d: (n, 0)),
                    pl.BlockSpec((tn1, 1), lambda n, d: (n, 0)),
                    pl.BlockSpec((1, td), lambda n, d: (0, d)),
                    pl.BlockSpec((1, td), lambda n, d: (0, d)),
                ],
                out_specs=pl.BlockSpec((tn1, td), lambda n, d: (n, d)),
            ),
            compiler_params=pltpu.CompilerParams(
                dimension_semantics=("parallel", "parallel"),
                vmem_limit_bytes=vmem_limit,
            ),
            cost_estimate=pl.CostEstimate(
                flops=4 * N * Dp,
                transcendentals=0,
                bytes_accessed=2 * N * Dp * itemsize + 2 * Dp * w_item,
            ),
        )(x2, mean, inv, w2, b2)

    if Dp != D:
        out2 = out2[:, :D]
    return out2.reshape(N, C, H, W)


def layer_norm_reference(x, weight, bias, eps=1e-6):
    """Pure-JAX reference matching the PyTorch forward exactly."""
    x = x.astype(jnp.float32)
    mean = jnp.mean(x, axis=(1, 2, 3), keepdims=True)
    numel = x.shape[1] * x.shape[2] * x.shape[3]
    var = jnp.sum((x - mean) ** 2, axis=(1, 2, 3), keepdims=True) / (numel - 1)
    std = jnp.sqrt(var)
    return weight * (x - mean) / (std + eps) + bias


if __name__ == "__main__":
    key = jax.random.PRNGKey(0)

    N, C, H, W = 2, 4, 16, 16
    normalized_shape = (C, H, W)

    x = jax.random.normal(key, (N, C, H, W), dtype=jnp.float32)
    # Deterministic parameter init per the module's __init__:
    #   weight = ones(normalized_shape), bias = zeros(normalized_shape)
    weight = jnp.ones(normalized_shape, dtype=jnp.float32)
    bias = jnp.zeros(normalized_shape, dtype=jnp.float32)

    ref = layer_norm_reference(x, weight, bias, eps=1e-6)

    # Fused single-pass path (the one real workloads with moderate D use).
    out = layer_norm_channels_first(x, weight, bias, eps=1e-6)
    out = jax.block_until_ready(out)
    assert out.shape == (N, C, H, W)
    assert jnp.allclose(out, ref, atol=1e-5, rtol=1e-5)

    # Also exercise the two-pass D-tiled path (used when C*H*W is too large for VMEM),
    # with a small forced column tile so the reduction accumulates over several steps.
    out2 = layer_norm_channels_first(x, weight, bias, eps=1e-6,
                                     force_two_pass=True, _max_td=256)
    out2 = jax.block_until_ready(out2)
    assert jnp.allclose(out2, ref, atol=1e-5, rtol=1e-5)

    print("KERNEL_OK")
</pallas_src>

<mosaic_0001>
module attributes {stable_mosaic.version = 11 : i64} {
  func.func @_ln_fused_kernel(%arg0: i32, %arg1: memref<2x1024xf32, #tpu.memory_space<vmem>>, %arg2: memref<1x1024xf32, #tpu.memory_space<vmem>>, %arg3: memref<1x1024xf32, #tpu.memory_space<vmem>>, %arg4: memref<2x1024xf32, #tpu.memory_space<vmem>>) attributes {dimension_semantics = [#tpu.dimension_semantics<parallel>], iteration_bounds = array<i64: 1>, scalar_prefetch = 0 : i64, scratch_operands = 0 : i64, tpu.core_type = #tpu.core_type<tc>, window_params = [{transform_indices = @transform_0, window_bounds = array<i64: 2, 1024>}, {pipeline_mode = #tpu.pipeline_mode<synchronous>, transform_indices = @transform_1, window_bounds = array<i64: 1, 1024>}, {pipeline_mode = #tpu.pipeline_mode<synchronous>, transform_indices = @transform_2, window_bounds = array<i64: 1, 1024>}, {transform_indices = @transform_3, window_bounds = array<i64: 2, 1024>}]} {
    %c0 = arith.constant 0 : index
    %c0_0 = arith.constant 0 : index
    %0 = vector.load %arg1[%c0, %c0_0] : memref<2x1024xf32, #tpu.memory_space<vmem>>, vector<2x1024xf32>
    %cst = arith.constant dense<0.000000e+00> : vector<2xf32>
    %1 = vector.multi_reduction <add>, %0, %cst [1] : vector<2x1024xf32> to vector<2xf32>
    %2 = vector.shape_cast %1 : vector<2xf32> to vector<2x1xf32>
    %3 = arith.mulf %0, %0 : vector<2x1024xf32>
    %cst_1 = arith.constant dense<0.000000e+00> : vector<2xf32>
    %4 = vector.multi_reduction <add>, %3, %cst_1 [1] : vector<2x1024xf32> to vector<2xf32>
    %5 = vector.shape_cast %4 : vector<2xf32> to vector<2x1xf32>
    %cst_2 = arith.constant 9.765625E-4 : f32
    %6 = vector.broadcast %cst_2 : f32 to vector<2x1xf32>
    %7 = arith.mulf %2, %6 : vector<2x1xf32>
    %cst_3 = arith.constant 1.024000e+03 : f32
    %8 = vector.broadcast %cst_3 : f32 to vector<2x1xf32>
    %9 = arith.mulf %8, %7 : vector<2x1xf32>
    %10 = arith.mulf %9, %7 : vector<2x1xf32>
    %11 = arith.subf %5, %10 : vector<2x1xf32>
    %cst_4 = arith.constant 1.023000e+03 : f32
    %12 = vector.broadcast %cst_4 : f32 to vector<2x1xf32>
    %13 = arith.divf %11, %12 : vector<2x1xf32>
    %cst_5 = arith.constant 0.000000e+00 : f32
    %14 = vector.broadcast %cst_5 : f32 to vector<2x1xf32>
    %15 = arith.maximumf %13, %14 : vector<2x1xf32>
    %16 = math.sqrt %15 : vector<2x1xf32>
    %cst_6 = arith.constant 9.99999997E-7 : f32
    %17 = vector.broadcast %cst_6 : f32 to vector<2x1xf32>
    %18 = arith.addf %16, %17 : vector<2x1xf32>
    %cst_7 = arith.constant 1.000000e+00 : f32
    %19 = vector.broadcast %cst_7 : f32 to vector<2x1xf32>
    %20 = arith.divf %19, %18 : vector<2x1xf32>
    %c0_8 = arith.constant 0 : index
    %c0_9 = arith.constant 0 : index
    %21 = vector.load %arg2[%c0_8, %c0_9] : memref<1x1024xf32, #tpu.memory_space<vmem>>, vector<1x1024xf32>
    %c0_10 = arith.constant 0 : index
    %c0_11 = arith.constant 0 : index
    %22 = vector.load %arg3[%c0_10, %c0_11] : memref<1x1024xf32, #tpu.memory_space<vmem>>, vector<1x1024xf32>
    %23 = vector.broadcast %7 : vector<2x1xf32> to vector<2x1024xf32>
    %24 = arith.subf %0, %23 : vector<2x1024xf32>
    %25 = vector.broadcast %20 : vector<2x1xf32> to vector<2x1024xf32>
    %26 = arith.mulf %24, %25 : vector<2x1024xf32>
    %27 = vector.broadcast %21 : vector<1x1024xf32> to vector<2x1024xf32>
    %28 = arith.mulf %26, %27 : vector<2x1024xf32>
    %29 = vector.broadcast %22 : vector<1x1024xf32> to vector<2x1024xf32>
    %30 = arith.addf %28, %29 : vector<2x1024xf32>
    %c0_12 = arith.constant 0 : index
    %c0_13 = arith.constant 0 : index
    %31 = vector.load %arg4[%c0_12, %c0_13] : memref<2x1024xf32, #tpu.memory_space<vmem>>, vector<2x1024xf32>
    tpu.vector_store %arg4[%c0_12, %c0_13], %30 {strides = array<i32>} : memref<2x1024xf32, #tpu.memory_space<vmem>>, vector<2x1024xf32>,
    return
  }
  func.func @transform_0(%arg0: i32) -> (i32, i32) {
    %c0_i32 = arith.constant 0 : i32
    %c0_i32_0 = arith.constant 0 : i32
    return %arg0, %c0_i32 : i32, i32
  }
  func.func @transform_1(%arg0: i32) -> (i32, i32) {
    %c0_i32 = arith.constant 0 : i32
    %c0_i32_0 = arith.constant 0 : i32
    %c0_i32_1 = arith.constant 0 : i32
    return %c0_i32, %c0_i32_0 : i32, i32
  }
  func.func @transform_2(%arg0: i32) -> (i32, i32) {
    %c0_i32 = arith.constant 0 : i32
    %c0_i32_0 = arith.constant 0 : i32
    %c0_i32_1 = arith.constant 0 : i32
    return %c0_i32, %c0_i32_0 : i32, i32
  }
  func.func @transform_3(%arg0: i32) -> (i32, i32) {
    %c0_i32 = arith.constant 0 : i32
    %c0_i32_0 = arith.constant 0 : i32
    return %arg0, %c0_i32 : i32, i32
  }
}

</mosaic_0001>

<bundles_post_ra>
// kernel: tpu_custom_call.1
= control target key start
LH: loop header
LB: loop body
LE: loop exit
PB: predicated region body
PF: predicated region fallthrough
CT: control target
= control target key end

     0   :  { %8 = vsyncpa [#allocation3], 0  ;;  %s620_s0 = inlined_call_operand.hbm [shape: f32[2,1024], index: 0, kind: input, shape index: {}]   ;;  %s621_s1 = inlined_call_operand.hbm [shape: f32[1,1024], index: 1, kind: input, shape index: {}]   ;;  %s622_s2 = inlined_call_operand.hbm [shape: f32[1,1024], index: 2, kind: input, shape index: {}]   ;;  %s623_s3 = inlined_call_operand.hbm [shape: f32[2,1024], index: 3, kind: output, shape index: {}]  }
   0x1   :  { %9 = vsyncpa [#allocation6], 0 }
   0x2   :  { %10 = vsyncpa [#allocation4], 0  ;;  %s484_s12 = smov [#allocation5]   ;;  %s485_s14 = smov [#allocation2]  }
   0x3   :  { %s27_s13 = sshll.u32 %s484_s12, 4  ;;  %s17_s15 = sshll.u32 %s485_s14, 4  ;;  %s28_s13 = int_to_ptr.vmem [resolvable:$true] %s27_s13  ;;  %s18_s15 = int_to_ptr.vmem [resolvable:$true] %s17_s15 }
   0x4   :  { %s390_s18 = scalar_lea.hbm %s621_s1, 128 }
   0x5   :  { %p391_p0 = scmp.ne.s32.totalorder %s621_s1, %s390_s18  ;;  %p394_p1 = scmp.lt.u32.totalorder %s390_s18, %s621_s1 }
   0x7   :  { %p396_p2 = pnand %p394_p1, %p391_p0 }
   0x9   :  { %399 = shalt.err (!%p396_p2)
}
   0xa   :  { %s400_s23 = scalar_lea.vmem %s28_s13, 128  ;;  %p405_p4 = scmp.lt.s32.totalorder %s28_s13, %s28_s13 }
   0xb   :  { %p401_p3 = scmp.ne.s32.totalorder %s28_s13, %s400_s23  ;;  %p406_p5 = scmp.lt.s32.totalorder %s400_s23, %s400_s23 }
   0xd   :  { %p407_p6 = por %p406_p5, %p405_p4 }
   0xf   :  { %p408_p7 = pnand %p407_p6, %p401_p3 }
  0x11   :  { %411 = shalt.err (!%p408_p7)
}
  0x12   :  { %30 = dma.hbm_to_vmem [thread:$0]  %s621_s1, 128, %s28_s13, [#allocation6]  }
  0x13   :  { %s412_s28 = scalar_lea.hbm %s620_s0, 256 }
  0x14   :  { %p413_p8 = scmp.ne.s32.totalorder %s620_s0, %s412_s28  ;;  %p416_p9 = scmp.lt.u32.totalorder %s412_s28, %s620_s0 }
  0x16   :  { %p418_p10 = pnand %p416_p9, %p413_p8 }
  0x18   :  { %421 = shalt.err (!%p418_p10)
}
  0x19   :  { %s422_s6 = scalar_lea.vmem %s18_s15, 256  ;;  %p427_p12 = scmp.lt.s32.totalorder %s18_s15, %s18_s15 }
  0x1a   :  { %p423_p11 = scmp.ne.s32.totalorder %s18_s15, %s422_s6  ;;  %p428_p13 = scmp.lt.s32.totalorder %s422_s6, %s422_s6 }
  0x1c   :  { %p429_p0 = por %p428_p13, %p427_p12 }
  0x1e   :  { %p430_p1 = pnand %p429_p0, %p423_p11 }
  0x20   :  { %433 = shalt.err (!%p430_p1)
}
  0x21   :  { %20 = dma.hbm_to_vmem [thread:$0]  %s620_s0, 256, %s18_s15, [#allocation3]  }
  0x22   :  { %s486_s8 = smov [#allocation7]   ;;  %s434_s12 = scalar_lea.hbm %s622_s2, 128 }
  0x23   :  { %s37_s9 = sshll.u32 %s486_s8, 4  ;;  %p435_p2 = scmp.ne.s32.totalorder %s622_s2, %s434_s12  ;;  %s38_s9 = int_to_ptr.vmem [resolvable:$true] %s37_s9 }
  0x24   :  { %p438_p3 = scmp.lt.u32.totalorder %s434_s12, %s622_s2 }
  0x26   :  { %p440_p4 = pnand %p438_p3, %p435_p2 }
  0x28   :  { %443 = shalt.err (!%p440_p4)
}
  0x29   :  { %s444_s18 = scalar_lea.vmem %s38_s9, 128  ;;  %p449_p6 = scmp.lt.s32.totalorder %s38_s9, %s38_s9 }
  0x2a   :  { %p445_p5 = scmp.ne.s32.totalorder %s38_s9, %s444_s18  ;;  %p450_p7 = scmp.lt.s32.totalorder %s444_s18, %s444_s18 }
  0x2c   :  { %p451_p8 = por %p450_p7, %p449_p6 }
  0x2e   :  { %p452_p9 = pnand %p451_p8, %p445_p5 }
  0x30   :  { %455 = shalt.err (!%p452_p9)
}
  0x31   :  { %40 = dma.hbm_to_vmem [thread:$0]  %s622_s2, 128, %s38_s9, [#allocation6]  }
  0x32   :  { %478 = dma.done.wait [#allocation3], 256  }
  0x33   :  { %479 = vsyncadd [#allocation3], 4294967040 }
  0x34   :  { %480 = dma.done.wait [#allocation6], 256  }
  0x35   :  { %481 = vsyncadd [#allocation6], 4294967040  ;;  %v58_v0 = vlaneseq  ;;  %v487_v1 = vmov 1983009808   ;;  %v551_v6 = vld [vmem:[#allocation2] sm:$0xff]  ;;  %v553_v7 = vld [vmem:[#allocation2 + $0x8] sm:$0xff] }
  0x36   :  { %v56_v2 = vunpack.c.l.s4 %v487_v1  ;;  %v54_v8 = vcombine.high %v551_v6, %v551_v6  ;;  %vm96_vm0 = vcmask 1041408   ;;  %v71_v10 = vcombine.high %v553_v7, %v553_v7  ;;  %s489_s2 = smov [#allocation8]  }
  0x37   :  { %v546_v3 = vshrl.u32 %v58_v0, 7  ;;  %v114_v11 = vmul.f32 %v551_v6, %v551_v6  ;;  %v115_v16 = vmul.f32 %v553_v7, %v553_v7  ;;  %s368_s19 = sshll.u32 %s489_s2, 4  ;;  %s369_s19 = int_to_ptr.vmem [resolvable:$true] %s368_s19 }
  0x38   :  { %v57_v4 = vunpack.c.0.s8 %v56_v2  ;;  %s456_s20 = scalar_lea.vmem %s369_s19, 256  ;;  %p461_p11 = scmp.lt.s32.totalorder %s369_s19, %s369_s19 }
  0x39   :  { %v118_v17 = vcombine.high %v114_v11, %v114_v11  ;;  %v135_v28 = vcombine.high %v115_v16, %v115_v16  ;;  %p457_p10 = scmp.ne.s32.totalorder %s369_s19, %s456_s20  ;;  %p462_p12 = scmp.lt.s32.totalorder %s456_s20, %s456_s20 }
  0x3a   :  { %v549_v5 = vsub.s32 %v57_v4, %v546_v3 }
  0x3b   :  { %p463_p13 = por %p462_p12, %p461_p11 }
  0x3c   :  { %v61_v9 = vrot.slane %v551_v6, %v549_v5  ;;  %v68_v12 = vrot.slane %v54_v8, %v549_v5  ;;  %v78_v14 = vrot.slane %v553_v7, %v549_v5  ;;  %v125_v18 = vrot.slane %v114_v11, %v549_v5 }
  0x3d   :  { %v85_v22 = vrot.slane %v71_v10, %v549_v5  ;;  %v132_v24 = vrot.slane %v118_v17, %v549_v5  ;;  %v142_v31 = vrot.slane %v115_v16, %v549_v5  ;;  %v149_v40 = vrot.slane %v135_v28, %v549_v5  ;;  %p464_p0 = pnand %p463_p13, %p457_p10 }
  0x3e   :  { %v69_v13 = vcombine.high %v61_v9, %v61_v9  ;;  %v97_v15 = vsel %vm96_vm0, %v61_v9, 0.0  ;;  %v70_v19 = vcombine.high %v68_v12, %v68_v12  ;;  %v100_v21 = vsel %vm96_vm0, %v68_v12, 0.0 }
  0x3f   :  { %v86_v25 = vcombine.high %v78_v14, %v78_v14  ;;  %v133_v27 = vcombine.high %v125_v18, %v125_v18  ;;  %v134_v30 = vcombine.high %v132_v24, %v132_v24  ;;  %v160_v32 = vsel %vm96_vm0, %v125_v18, 0.0 }
  0x40   :  { %v98_v20 = vsel %vm96_vm0, %v69_v13, 0.0  ;;  %v102_v26 = vsel %vm96_vm0, %v70_v19, 0.0  ;;  %v104_v33 = vsel %vm96_vm0, %v78_v14, 0.0  ;;  %v163_v35 = vsel %vm96_vm0, %v132_v24, 0.0 }
  0x41   :  { %v99_v23 = vadd.f32 %v98_v20, %v97_v15  ;;  %v161_v34 = vsel %vm96_vm0, %v133_v27, 0.0  ;;  %v87_v36 = vcombine.high %v85_v22, %v85_v22  ;;  %v106_v39 = vsel %vm96_vm0, %v86_v25, 0.0  ;;  %v194_v15 = vld [vmem:[#allocation5] sm:$0xff] }
  0x42   :  { %v162_v38 = vadd.f32 %v161_v34, %v160_v32  ;;  %v150_v41 = vcombine.high %v142_v31, %v142_v31  ;;  %v165_v42 = vsel %vm96_vm0, %v134_v30, 0.0  ;;  %v108_v45 = vsel %vm96_vm0, %v85_v22, 0.0 }
  0x43   :  { %v101_v29 = vadd.f32 %v100_v21, %v99_v23  ;;  %v167_v46 = vsel %vm96_vm0, %v142_v31, 0.0  ;;  %v110_v49 = vsel %vm96_vm0, %v87_v36, 0.0  ;;  %v151_v50 = vcombine.high %v149_v40, %v149_v40  ;;  %v195_v23 = vld [vmem:[#allocation7] sm:$0xff] }
  0x44   :  { %v164_v44 = vadd.f32 %v163_v35, %v162_v38  ;;  %v169_v51 = vsel %vm96_vm0, %v150_v41, 0.0  ;;  %v171_v54 = vsel %vm96_vm0, %v149_v40, 0.0  ;;  %v488_v9 = vmov 269488144  }
  0x45   :  { %v103_v37 = vadd.f32 %v102_v26, %v101_v29  ;;  %v173_v57 = vsel %vm96_vm0, %v151_v50, 0.0  ;;  %v198_v10 = vunpack.c.l.s4 %v488_v9  ;;  %v221_v11 = vsub.s32 0, %v546_v3 }
  0x46   :  { %v166_v48 = vadd.f32 %v165_v42, %v164_v44  ;;  %v225_v12 = vsub.s32 1, %v546_v3  ;;  %v229_v13 = vsub.s32 2, %v546_v3  ;;  %v233_v16 = vsub.s32 3, %v546_v3 }
  0x47   :  { %v105_v43 = vadd.f32 %v104_v33, %v103_v37  ;;  %v237_v17 = vsub.s32 4, %v546_v3  ;;  %v241_v18 = vsub.s32 5, %v546_v3  ;;  %v245_v20 = vsub.s32 6, %v546_v3 }
  0x48   :  { %v168_v53 = vadd.f32 %v167_v46, %v166_v48  ;;  %v249_v21 = vsub.s32 7, %v546_v3  ;;  %v199_v24 = vunpack.c.0.s8 %v198_v10  ;;  %v222_v26 = vrot.slane %v194_v15, %v221_v11 }
  0x49   :  { %v107_v47 = vadd.f32 %v106_v39, %v105_v43  ;;  %v226_v27 = vrot.slane %v194_v15, %v225_v12  ;;  %v230_v29 = vrot.slane %v194_v15, %v229_v13  ;;  %v234_v30 = vrot.slane %v194_v15, %v233_v16 }
  0x4a   :  { %v170_v56 = vadd.f32 %v169_v51, %v168_v53  ;;  %v238_v31 = vrot.slane %v194_v15, %v237_v17  ;;  %v242_v32 = vrot.slane %v194_v15, %v241_v18  ;;  %v246_v33 = vrot.slane %v194_v15, %v245_v20 }
  0x4b   :  { %v109_v52 = vadd.f32 %v108_v45, %v107_v47  ;;  %v250_v34 = vrot.slane %v194_v15, %v249_v21  ;;  %v293_v35 = vrot.slane %v195_v23, %v221_v11  ;;  %v297_v36 = vrot.slane %v195_v23, %v225_v12 }
  0x4c   :  { %v172_v58 = vadd.f32 %v171_v54, %v170_v56  ;;  %v301_v37 = vrot.slane %v195_v23, %v229_v13  ;;  %v305_v38 = vrot.slane %v195_v23, %v233_v16  ;;  %v309_v39 = vrot.slane %v195_v23, %v237_v17 }
  0x4d   :  { %v111_v55 = vadd.f32 %v110_v49, %v109_v52  ;;  %v313_v40 = vrot.slane %v195_v23, %v241_v18  ;;  %v317_v41 = vrot.slane %v195_v23, %v245_v20  ;;  %v321_v42 = vrot.slane %v195_v23, %v249_v21 }
  0x4e   :  { %v174_v59 = vadd.f32 %v173_v57, %v172_v58  ;;  %v251_v43 = vcombine.low %v222_v26, %v226_v27  ;;  %v252_v44 = vcombine.low %v230_v29, %v234_v30  ;;  %v202_v45 = vsub.s32 %v199_v24, %v546_v3 }
  0x4f   :  { %112 = vadd.xlane.f32.xlu0 %v111_v55  ;;  %v268_v46 = vcombine.low %v238_v31, %v242_v32  ;;  %v269_v47 = vcombine.low %v246_v33, %v250_v34  ;;  %v322_v48 = vcombine.low %v293_v35, %v297_v36  ;;  %v323_v49 = vcombine.low %v301_v37, %v305_v38 }
  0x50   :  { %v339_v50 = vcombine.low %v309_v39, %v313_v40  ;;  %v340_v51 = vcombine.low %v317_v41, %v321_v42  ;;  %v259_v52 = vrot.slane %v251_v43, %v549_v5  ;;  %v266_v53 = vrot.slane %v252_v44, %v549_v5 }
  0x51   :  { %v276_v55 = vrot.slane %v268_v46, %v549_v5  ;;  %v283_v56 = vrot.slane %v269_v47, %v549_v5  ;;  %v330_v57 = vrot.slane %v322_v48, %v549_v5  ;;  %v337_v58 = vrot.slane %v323_v49, %v549_v5 }
  0x52   :  { %v347_v3 = vrot.slane %v339_v50, %v549_v5 }
  0x53   :  { %175 = vadd.xlane.f32.xlu0 %v174_v59  ;;  %v354_v59 = vrot.slane %v340_v51, %v549_v5 }
  0x55   :  { %v355_v9 = vcombine.low %v347_v3, %v354_v59 }
  0xdc   :  { %v113_v60 = vpop.xlane.xlu0 %112 }
  0xdd   :  { %v177_v61 = vmul.f32 0.0009765625, %v113_v60 }
  0xdf   :  { %v178_v62 = vmul.f32 1024.0, %v177_v61  ;;  %v203_v54 = vrot.slane %v177_v61, %v202_v45 }
  0xe0   :  { %v176_v63 = vpop.xlane.xlu0 %175 }
  0xe1   :  { %v179_v0 = vmul.f32 %v178_v62, %v177_v61  ;;  %v267_v62 = vcombine.low %v259_v52, %v266_v53  ;;  %v284_v61 = vcombine.low %v276_v55, %v283_v56 }
  0xe3   :  { %v180_v1 = vsub.f32 %v176_v63, %v179_v0  ;;  %v205_v63 = vsub.f32 %v551_v6, %v203_v54  ;;  %v206_v0 = vsub.f32 %v553_v7, %v203_v54 }
  0xe5   :  { %v182_v2 = vmul.f32 0.0009775171, %v180_v1 }
  0xe7   :  { %v183_v4 = vmax.f32 %v182_v2, 0.0 }
  0xe9   :  { %386 = vrsqrt.f32 %v183_v4  ;;  %vm186_vm1 = vcmp.eq.f32.partialorder %v183_v4, inf  ;;  %v189_v19 = vand.u32 2147483648, %v183_v4  ;;  %vm188_vm2 = vcmp.eq.f32.partialorder %v183_v4, 0.0 }
  0xf3   :  { %v387_v8 = vpop.eup %386 }
  0xf4   :  { %v185_v14 = vmul.f32 %v387_v8, %v183_v4  ;;  %v338_v8 = vcombine.low %v330_v57, %v337_v58 }
  0xf6   :  { %v187_v22 = vsel %vm186_vm1, %v183_v4, %v185_v14 }
  0xf7   :  { %v190_v25 = vsel %vm188_vm2, %v189_v19, %v187_v22 }
  0xf8   :  { %v191_v28 = vadd.f32 1e-06, %v190_v25 }
  0xfa   :  { %388 = vrcp.f32 %v191_v28 }
 0x104   :  { %v389_v60 = vpop.eup %388 }
 0x105   :  { %v214_v1 = vrot.slane %v389_v60, %v202_v45 }
 0x107   :  { %v216_v2 = vmul.f32 %v214_v1, %v205_v63  ;;  %v217_v4 = vmul.f32 %v214_v1, %v206_v0 }
 0x109   :  { %v287_v10 = vmul.f32 %v267_v62, %v216_v2  ;;  %v288_v11 = vmul.f32 %v284_v61, %v217_v4 }
 0x10b   :  { %v358_v12 = vadd.f32 %v338_v8, %v287_v10  ;;  %v359_v13 = vadd.f32 %v355_v9, %v288_v11 }
 0x10d   :  { %360 = vst [vmem:[#allocation8] sm:$0xff] %v358_v12  ;;  %361 = vst [vmem:[#allocation8 + $0x8] sm:$0xff] %v359_v13 }
 0x10e   :  { %467 = shalt.err (!%p464_p0)
}
 0x10f   :  { %s468_s23 = scalar_lea.hbm %s623_s3, 256 }
 0x110   :  { %p469_p1 = scmp.ne.s32.totalorder %s623_s3, %s468_s23  ;;  %p472_p2 = scmp.lt.u32.totalorder %s468_s23, %s623_s3 }
 0x112   :  { %p474_p3 = pnand %p472_p2, %p469_p1 }
 0x114   :  { %477 = shalt.err (!%p474_p3)
}
 0x115   :  { %371 = dma.vmem_to_hbm [thread:$0]  %s369_s19, 256, %s623_s3, [#allocation4]  }
 0x116   :  { %482 = dma.done.wait [#allocation4], 256  }
 0x117   :  { %483 = vsyncadd [#allocation4], 4294967040 }
 0x118   :  { %375 = vsyncpa [#allocation3], 1 }
 0x119   :  { %376 = vsyncpa [#allocation6], 1 }
 0x11a   :  { %377 = vsyncpa [#allocation4], 1 }

</bundles_post_ra>
